<compile_context>
chip_gen: v6e
topology: v6e:2x2x1
jax: 0.10.0
libtpu: 0.0.40
codegen_flags: <defaults>
</compile_context>

<pallas_src>
import functools

import jax
import jax.numpy as jnp
from jax.experimental import pallas as pl
from jax.experimental.pallas import tpu as pltpu


DROPOUT_P = 0.25
_LANE = 128
_SUBLANE_ALIGN = {4: 8, 2: 16, 1: 32}     # itemsize -> native sublane tiling
_MIN_TILE_ROWS = 128                      # amortize ~0.35 us per-step overhead
_TARGET_STEPS = 8                         # >= 4 steps per TC on v7x megacore
_VMEM_BUDGET = 20 * 1024 * 1024           # per-tile working-set budget
_VMEM_LIMIT = 32 * 1024 * 1024            # explicit scoped-VMEM limit (safe on
                                          # v5e/v6e 128 MiB and v7x 64 MiB phys)


def _head_kernel_eval(x_ref, w_ref, b_ref, o_ref):
    # Dropout is identity in eval mode.
    x = x_ref[...]
    # [tile_b, H] @ [H, Lp] -> [tile_b, Lp], f32 accumulation on the MXU.
    logits = jnp.dot(x, w_ref[...], preferred_element_type=jnp.float32)
    logits = logits + b_ref[...]
    n = o_ref.shape[-1]                      # unpadded label count
    o_ref[...] = logits[:, :n].astype(o_ref.dtype)


def _head_kernel_train(seed_ref, x_ref, w_ref, b_ref, o_ref):
    # Inverted dropout using the TPU hardware PRNG. Mix the batch-tile index
    # into the seed so every tile gets a distinct mask.
    pltpu.prng_seed(seed_ref[0] + pl.program_id(0))
    x = x_ref[...]
    bits = pltpu.bitcast(pltpu.prng_random_bits(x.shape), jnp.uint32)
    # Integer threshold compare: keep iff bits >= p * 2^32  (keep-prob = 1-p).
    threshold = jnp.uint32(round(DROPOUT_P * (2 ** 32)))
    x = jnp.where(bits >= threshold, x, jnp.zeros_like(x))
    logits = jnp.dot(x, w_ref[...], preferred_element_type=jnp.float32)
    # Fold the 1/(1-p) scale into the f32 logits (cheaper than scaling x, and
    # avoids an extra rounding of x for low-precision inputs).
    logits = logits * jnp.float32(1.0 / (1.0 - DROPOUT_P)) + b_ref[...]
    n = o_ref.shape[-1]
    o_ref[...] = logits[:, :n].astype(o_ref.dtype)


def _choose_tile_b(B, H, Lp, x_itemsize, w_itemsize, out_itemsize):
    """Batch tile sizing: grid depth first, VMEM budget second."""
    align = _SUBLANE_ALIGN.get(x_itemsize, 8)
    if B < 2 * align:
        return B                                   # too small to split
    # Grid-depth target: ~_TARGET_STEPS steps for large batches (keeps the
    # x-stream DMA pipelined and both v7x TCs busy), at least 2 steps for
    # mid-size batches, but never below _MIN_TILE_ROWS rows per step.
    depth_tile = pl.cdiv(B, _TARGET_STEPS)
    tile = max(min(_MIN_TILE_ROWS, pl.cdiv(B, 2)), depth_tile)
    # Honest VMEM accounting (bytes):
    #   resident weight (default double-buffered) + bias, plus per-row cost of
    #   the double-buffered x block, double-buffered output block (lane-padded
    #   to Lp) and the f32 logits temporary.
    fixed = 2 * H * Lp * w_itemsize + 2 * Lp * 4
    per_row = 2 * H * x_itemsize + 2 * Lp * out_itemsize + Lp * 4
    cap = max(align, (_VMEM_BUDGET - fixed) // per_row)
    tile = min(tile, cap, B)
    tile = max(align, (tile // align) * align)     # dtype-aware sublane align
    return int(tile)


def _make_grid_spec(B, H, Lp, L, tile_b, num_scalar_prefetch):
    # `*_` absorbs the scalar-prefetch refs passed positionally to index_maps.
    return pltpu.PrefetchScalarGridSpec(
        num_scalar_prefetch=num_scalar_prefetch,
        grid=(pl.cdiv(B, tile_b),),
        in_specs=[
            pl.BlockSpec((tile_b, H), lambda i, *_: (i, 0)),   # x: streamed
            pl.BlockSpec((H, Lp), lambda i, *_: (0, 0)),       # weight^T: resident
            pl.BlockSpec((1, Lp), lambda i, *_: (0, 0)),       # bias: resident
        ],
        # Output is the unpadded [B, L] array: block last dim == full dim, so
        # no padded writeback and no wrapper-side slice pass.
        out_specs=pl.BlockSpec((tile_b, L), lambda i, *_: (i, 0)),
    )


@functools.partial(jax.jit, static_argnames=("training",))
def sequence_classification_head(pooled_output, weight, bias, *,
                                 training=False, seed=0):
    """pooled_output: [B, H]; weight: [L, H] (PyTorch layout); bias: [L]."""
    B, H = pooled_output.shape
    L = weight.shape[0]
    x_item = pooled_output.dtype.itemsize
    w_item = weight.dtype.itemsize

    # Pad the label dim up to a full 128-lane multiple and pre-transpose the
    # weight ONCE in the wrapper to [H, Lp]: the kernel then contracts with a
    # plain (K on sublane, N on lane) MXU matmul, no per-step RHS relayout.
    Lp = pl.cdiv(L, _LANE) * _LANE
    w_t = weight.T                                     # [H, L]
    bias_p = bias
    if Lp != L:
        w_t = jnp.pad(w_t, ((0, 0), (0, Lp - L)))      # [H, Lp]
        bias_p = jnp.pad(bias, (0, Lp - L))
    b2 = bias_p.reshape(1, Lp)

    tile_b = _choose_tile_b(B, H, Lp, x_item, w_item, x_item)
    out_shape = jax.ShapeDtypeStruct((B, L), pooled_output.dtype)
    cparams = pltpu.CompilerParams(
        dimension_semantics=("parallel",),
        vmem_limit_bytes=_VMEM_LIMIT)
    cost = pl.CostEstimate(
        flops=2 * B * H * Lp,
        transcendentals=0,
        bytes_accessed=B * H * x_item + H * Lp * w_item + B * L * x_item)

    if training:
        # TODO(synk): the dropout mask comes from the TPU hardware PRNG, so it
        # will not bit-match torch's RNG; callers must thread a fresh seed per
        # step. This path needs a real TPU (prng_seed has no interpret lowering).
        seed_arr = jnp.reshape(jnp.asarray(seed, dtype=jnp.int32), (1,))
        logits = pl.pallas_call(
            _head_kernel_train,
            out_shape=out_shape,
            grid_spec=_make_grid_spec(B, H, Lp, L, tile_b,
                                      num_scalar_prefetch=1),
            compiler_params=cparams,
            cost_estimate=cost,
        )(seed_arr, pooled_output, w_t, b2)
    else:
        logits = pl.pallas_call(
            _head_kernel_eval,
            out_shape=out_shape,
            grid_spec=_make_grid_spec(B, H, Lp, L, tile_b,
                                      num_scalar_prefetch=0),
            compiler_params=cparams,
            cost_estimate=cost,
        )(pooled_output, w_t, b2)

    return logits


def init_params(key, hidden_size, num_labels):
    # Mimic torch.nn.Linear default init: U(-1/sqrt(H), 1/sqrt(H)).
    kw, kb = jax.random.split(key)
    bound = 1.0 / (hidden_size ** 0.5)
    weight = jax.random.uniform(kw, (num_labels, hidden_size),
                                minval=-bound, maxval=bound, dtype=jnp.float32)
    bias = jax.random.uniform(kb, (num_labels,),
                              minval=-bound, maxval=bound, dtype=jnp.float32)
    return weight, bias


if __name__ == "__main__":
    key = jax.random.PRNGKey(0)
    k_in, k_param = jax.random.split(key)

    batch, hidden_size, num_labels = 8, 32, 4
    pooled_output = jax.random.normal(k_in, (batch, hidden_size),
                                      dtype=jnp.float32)
    weight, bias = init_params(k_param, hidden_size, num_labels)

    # Eval mode (dropout = identity): deterministic and checkable.
    logits = sequence_classification_head(pooled_output, weight, bias,
                                          training=False)
    jax.block_until_ready(logits)

    ref = pooled_output @ weight.T + bias
    assert logits.shape == (batch, num_labels)
    assert jnp.allclose(logits, ref, atol=1e-5, rtol=1e-5)

    print("KERNEL_OK")
</pallas_src>

<mosaic_0001>
module attributes {stable_mosaic.version = 11 : i64} {
  func.func @_head_kernel_eval(%arg0: i32, %arg1: memref<8x32xf32, #tpu.memory_space<vmem>>, %arg2: memref<32x128xf32, #tpu.memory_space<vmem>>, %arg3: memref<1x128xf32, #tpu.memory_space<vmem>>, %arg4: memref<8x4xf32, #tpu.memory_space<vmem>>) attributes {dimension_semantics = [#tpu.dimension_semantics<parallel>], iteration_bounds = array<i64: 1>, scalar_prefetch = 0 : i64, scratch_operands = 0 : i64, tpu.core_type = #tpu.core_type<tc>, window_params = [{transform_indices = @transform_0, window_bounds = array<i64: 8, 32>}, {pipeline_mode = #tpu.pipeline_mode<synchronous>, transform_indices = @transform_1, window_bounds = array<i64: 32, 128>}, {pipeline_mode = #tpu.pipeline_mode<synchronous>, transform_indices = @transform_2, window_bounds = array<i64: 1, 128>}, {transform_indices = @transform_3, window_bounds = array<i64: 8, 4>}]} {
    %c0 = arith.constant 0 : index
    %c0_0 = arith.constant 0 : index
    %0 = vector.load %arg1[%c0, %c0_0] : memref<8x32xf32, #tpu.memory_space<vmem>>, vector<8x32xf32>
    %c0_1 = arith.constant 0 : index
    %c0_2 = arith.constant 0 : index
    %1 = vector.load %arg2[%c0_1, %c0_2] : memref<32x128xf32, #tpu.memory_space<vmem>>, vector<32x128xf32>
    %cst = arith.constant dense<0.000000e+00> : vector<8x128xf32>
    %2 = tpu.matmul %0, %1, %cst {dimension_numbers = #tpu.dot_dimension_numbers<[1], [0], [0], [1], [0, 0, 1, 1], [], []>} : vector<8x32xf32>, vector<32x128xf32>, vector<8x128xf32> -> vector<8x128xf32>
    %c0_3 = arith.constant 0 : index
    %c0_4 = arith.constant 0 : index
    %3 = vector.load %arg3[%c0_3, %c0_4] : memref<1x128xf32, #tpu.memory_space<vmem>>, vector<1x128xf32>
    %4 = vector.broadcast %3 : vector<1x128xf32> to vector<8x128xf32>
    %5 = arith.addf %2, %4 : vector<8x128xf32>
    %6 = vector.extract_strided_slice %5 {offsets = [0, 0], sizes = [8, 4], strides = [1, 1]} : vector<8x128xf32> to vector<8x4xf32>
    %c0_5 = arith.constant 0 : index
    %c0_6 = arith.constant 0 : index
    %7 = vector.load %arg4[%c0_5, %c0_6] : memref<8x4xf32, #tpu.memory_space<vmem>>, vector<8x4xf32>
    tpu.vector_store %arg4[%c0_5, %c0_6], %6 {strides = array<i32>} : memref<8x4xf32, #tpu.memory_space<vmem>>, vector<8x4xf32>,
    return
  }
  func.func @transform_0(%arg0: i32) -> (i32, i32) {
    %c0_i32 = arith.constant 0 : i32
    %c0_i32_0 = arith.constant 0 : i32
    return %arg0, %c0_i32 : i32, i32
  }
  func.func @transform_1(%arg0: i32) -> (i32, i32) {
    %c0_i32 = arith.constant 0 : i32
    %c0_i32_0 = arith.constant 0 : i32
    %c0_i32_1 = arith.constant 0 : i32
    return %c0_i32, %c0_i32_0 : i32, i32
  }
  func.func @transform_2(%arg0: i32) -> (i32, i32) {
    %c0_i32 = arith.constant 0 : i32
    %c0_i32_0 = arith.constant 0 : i32
    %c0_i32_1 = arith.constant 0 : i32
    return %c0_i32, %c0_i32_0 : i32, i32
  }
  func.func @transform_3(%arg0: i32) -> (i32, i32) {
    %c0_i32 = arith.constant 0 : i32
    %c0_i32_0 = arith.constant 0 : i32
    return %arg0, %c0_i32 : i32, i32
  }
}

</mosaic_0001>

<bundles_post_ra>
// kernel: sequence_classification_head.1
= control target key start
LH: loop header
LB: loop body
LE: loop exit
PB: predicated region body
PF: predicated region fallthrough
CT: control target
= control target key end

     0   :  { %v126_v0 = vmov 0.0   ;;  %vm127_vm0 = vmmov 0   ;;  %vm26_vm1 = vcmask 261120   ;;  %vm100_vm2 = vcmask 31744   ;;  %s169_s1 = inlined_call_operand.vmem [shape: f32[32,128], index: 1, kind: input, shape index: {}]   ;;  %s170_s0 = inlined_call_operand.vmem [shape: f32[8,32], index: 0, kind: input, shape index: {}]   ;;  %s171_s2 = inlined_call_operand.vmem [shape: f32[1,128], index: 2, kind: input, shape index: {}]   ;;  %s172_s3 = inlined_call_operand.vmem [shape: f32[8,4], index: 3, kind: output, shape index: {}]  }
   0x1   :  { %113 = vmatprep.subr.mxu0 %v126_v0  ;;  %v18_v1 = vld [vmem:[%s169_s1 + $0x18] sm:$0xff]  ;;  %v17_v2 = vld [vmem:[%s169_s1 + $0x10] sm:$0xff]  ;;  %121 = vmatprep.mubr.msk.f32.mxu0 %vm127_vm0, %v126_v0  ;;  %v16_v3 = vld [vmem:[%s169_s1 + $0x8] sm:$0xff] }
   0x2   :  { %114 = vmatpush3.msra.mxu0 %v18_v1  ;;  %v15_v4 = vld [vmem:[%s169_s1] sm:$0xff] }
   0x3   :  { %115 = vmatprep.subr.mxu0 %v126_v0  ;;  %v14_v5 = vld [vmem:[%s170_s0] sm:$0xff] }
   0x4   :  { %116 = vmatpush3.msra.mxu0 %v17_v2  ;;  %v106_v6 = vld [vmem:[%s171_s2] ss:$0 sm:$0xff] }
   0x5   :  { %117 = vmatprep.subr.mxu0 %v126_v0 }
   0x6   :  { %118 = vmatpush3.msra.mxu0 %v16_v3 }
   0x7   :  { %119 = vmatprep.subr.mxu0 %v126_v0 }
   0x8   :  { %120 = vmatpush3.msra.mxu0 %v15_v4 }
   0x9   :  { %122 = vmatmul.mubr.msk.f32.vlgmr.msra.gmra.mxu0 %vm26_vm1, %v14_v5 }
  0xc9   :  { %v96_v7 = vpop.f32.mrf.mxu0 }
  0xca   :  { %v97_v8 = vadd.f32 %v106_v6, %v96_v7 }
  0xcb   :  { %v123_v9 = vpop.f32.mrf.mxu0 }
  0xcc   :  { %101 = vst.msk [vmem:[%s172_s3] sm:$0xff] %vm100_vm2, %v97_v8 }

</bundles_post_ra>
